<compile_context>
chip_gen: v7x
topology: tpu7x:2x2x1
jax: 0.10.0
libtpu: 0.0.40
codegen_flags: <defaults>
</compile_context>

<pallas_src>
import jax
import jax.numpy as jnp
from jax.experimental import pallas as pl
from jax.experimental.pallas import tpu as pltpu


def base_normal_kernel(p_ref, out_ref):
    """p_ref (SMEM, f32[8]) = [mu0, mu1, l00, l10, l11, eps0, eps1, pad]."""
    mu0, mu1 = p_ref[0], p_ref[1]
    l00, l10, l11 = p_ref[2], p_ref[3], p_ref[4]
    e0, e1 = p_ref[5], p_ref[6]

    # Reparameterized sample: row-vector form of loc + L @ eps.
    # Pure scalar/VPU math — no MXU push/pop, no transpose.
    out0 = mu0 + l00 * e0
    out1 = mu1 + l10 * e0 + l11 * e1

    lane = jax.lax.broadcasted_iota(jnp.int32, out_ref.shape, 1)  # [[0, 1]]
    out_ref[...] = jnp.where(lane == 0, out0, out1).astype(out_ref.dtype)


def base_normal_sample(mu, var, eps):
    """Sample MV(loc=mu, covariance_matrix=var) given eps ~ N(0, I_2).

    mu:  (1, 2) float32
    var: (2, 2) float32, positive (semi-)definite
    eps: (1, 2) float32 standard-normal draw
    """
    D = mu.shape[1]
    assert mu.shape == (1, D) and D == 2, "module hard-codes a 2x2 covariance"
    assert var.shape == (2, 2)
    assert eps.shape == (1, D)

    # Analytic 2x2 lower Cholesky with a PD guard (avoids NaN propagation on
    # borderline covariances; torch would raise instead).
    a, b, c = var[0, 0], var[1, 0], var[1, 1]
    l00 = jnp.sqrt(jnp.maximum(a, 0.0))
    l10 = b / l00
    l11 = jnp.sqrt(jnp.maximum(c - l10 * l10, 0.0))

    # Pack everything the kernel needs into one small SMEM-resident vector.
    params = jnp.stack(
        [mu[0, 0], mu[0, 1], l00, l10, l11, eps[0, 0], eps[0, 1], 0.0]
    ).astype(jnp.float32)

    return pl.pallas_call(
        base_normal_kernel,
        out_shape=jax.ShapeDtypeStruct((1, D), jnp.float32),
        in_specs=[pl.BlockSpec(memory_space=pltpu.MemorySpace.SMEM)],
        out_specs=pl.BlockSpec(memory_space=pltpu.MemorySpace.VMEM),
    )(params)


if __name__ == "__main__":
    D = 2  # covariance is eye(2) in the module, so the event dim must be 2

    # Deterministic "parameters" matching nn.Module __init__.
    mu = jnp.ones((1, D), jnp.float32)     # torch.ones(1, D)
    var = jnp.eye(2, dtype=jnp.float32)    # torch.eye(2)

    # Stochastic part of .sample().
    # TODO(synk): torch's MultivariateNormal RNG stream cannot be matched
    # bitwise; semantics (mu + cholesky(var) @ eps) are reproduced exactly.
    key = jax.random.PRNGKey(0)
    eps = jax.random.normal(key, (1, D), jnp.float32)

    sample = jax.block_until_ready(base_normal_sample(mu, var, eps))
    assert sample.shape == (1, D) and sample.dtype == jnp.float32
    # With var = I the sample must equal mu + eps exactly.
    assert jnp.allclose(sample, mu + eps, atol=1e-6), (sample, mu + eps)

    # Non-identity covariance check against a plain-JAX reference.
    var2 = jnp.array([[2.0, 0.6], [0.6, 1.5]], jnp.float32)
    sample2 = jax.block_until_ready(base_normal_sample(mu, var2, eps))
    expected2 = mu + eps @ jnp.linalg.cholesky(var2).T
    assert jnp.allclose(sample2, expected2, atol=1e-5), (sample2, expected2)

    print("KERNEL_OK")
</pallas_src>

<mosaic_0001>
module attributes {stable_mosaic.version = 11 : i64} {
  func.func @base_normal_kernel(%arg0: memref<8xf32, #tpu.memory_space<smem>>, %arg1: memref<1x2xf32, #tpu.memory_space<vmem>>) attributes {dimension_semantics = [], scalar_prefetch = 0 : i64, scratch_operands = 0 : i64, tpu.core_type = #tpu.core_type<tc>} {
    %c0 = arith.constant 0 : index
    %0 = memref.load %arg0[%c0] : memref<8xf32, #tpu.memory_space<smem>>
    %c1 = arith.constant 1 : index
    %1 = memref.load %arg0[%c1] : memref<8xf32, #tpu.memory_space<smem>>
    %c2 = arith.constant 2 : index
    %2 = memref.load %arg0[%c2] : memref<8xf32, #tpu.memory_space<smem>>
    %c3 = arith.constant 3 : index
    %3 = memref.load %arg0[%c3] : memref<8xf32, #tpu.memory_space<smem>>
    %c4 = arith.constant 4 : index
    %4 = memref.load %arg0[%c4] : memref<8xf32, #tpu.memory_space<smem>>
    %c5 = arith.constant 5 : index
    %5 = memref.load %arg0[%c5] : memref<8xf32, #tpu.memory_space<smem>>
    %c6 = arith.constant 6 : index
    %6 = memref.load %arg0[%c6] : memref<8xf32, #tpu.memory_space<smem>>
    %7 = arith.mulf %2, %5 : f32
    %8 = arith.addf %0, %7 : f32
    %9 = arith.mulf %3, %5 : f32
    %10 = arith.addf %1, %9 : f32
    %11 = arith.mulf %4, %6 : f32
    %12 = arith.addf %10, %11 : f32
    %13 = tpu.iota {dimensions = array<i32: 1>} : vector<1x2xi32>
    %c0_i32 = arith.constant 0 : i32
    %14 = vector.broadcast %c0_i32 : i32 to vector<1x2xi32>
    %15 = arith.cmpi eq, %13, %14 : vector<1x2xi32>
    %16 = vector.broadcast %8 : f32 to vector<1x2xf32>
    %17 = vector.broadcast %12 : f32 to vector<1x2xf32>
    %18 = arith.select %15, %16, %17 : vector<1x2xi1>, vector<1x2xf32>
    %c0_0 = arith.constant 0 : index
    %c0_1 = arith.constant 0 : index
    %19 = vector.load %arg1[%c0_0, %c0_1] : memref<1x2xf32, #tpu.memory_space<vmem>>, vector<1x2xf32>
    tpu.vector_store %arg1[%c0_0, %c0_1], %18 {strides = array<i32>} : memref<1x2xf32, #tpu.memory_space<vmem>>, vector<1x2xf32>,
    return
  }
}

</mosaic_0001>

<bundles_post_ra>
// kernel: tpu_custom_call.1
= control target key start
LH: loop header
LB: loop body
LE: loop exit
PB: predicated region body
PF: predicated region fallthrough
CT: control target
= control target key end

     0   :  { %6 = vsyncpa [#allocation4], 0  ;;  %s136_s0 = inlined_call_operand.hbm [shape: f32[8], index: 0, kind: input, shape index: {}]   ;;  %s137_s1 = inlined_call_operand.hbm [shape: f32[1,2], index: 1, kind: output, shape index: {}]  }
   0x1   :  { %7 = vsyncpa [#allocation3], 0  ;;  %s64_s8 = scalar_lea.hbm %s136_s0, 16 }
   0x2   :  { %p65_p0 = scmp.ne.s32.totalorder %s136_s0, %s64_s8  ;;  %p68_p1 = scmp.lt.u32.totalorder %s64_s8, %s136_s0 }
   0x4   :  { %p70_p2 = pnand %p68_p1, %p65_p0 }
   0x6   :  { %73 = shalt.err (!%p70_p2)
}
   0x7   :  { %s100_s13 = smov [#allocation2]  }
   0x8   :  { %15 = dma.hbm_to_smem %s136_s0, 16, %s100_s13, [#allocation4]  }
   0x9   :  { %96 = dma.done.wait [#allocation4], 16  }
   0xa   :  { %97 = vsyncadd [#allocation4], 4294967280 }
   0xb   :  { %19 = sfence }
   0xc   :  { %s20_s16 = sld [smem:[#allocation2]]  ;;  %s57_s17 = sld [smem:[#allocation2 + $0x2]]  ;;  %v33_v0 = vlaneseq  ;;  %vm39_vm1 = vcmask 8192  }
   0xd   :  { %s58_s18 = sld [smem:[#allocation2 + $0x3]]  ;;  %s59_s19 = sld [smem:[#allocation2 + $0x4]] }
   0xe   :  { %s60_s20 = sld [smem:[#allocation2 + $0x5]]  ;;  %s56_s21 = sld [smem:[#allocation2 + $0x1]]  ;;  %v34_v1 = vand.u32 127, %v33_v0 }
   0xf   :  { %s61_s22 = sld [smem:[#allocation2 + $0x6]]  ;;  %s101_s28 = smov [#allocation5]  }
  0x10   :  { %s47_s29 = sshll.u32 %s101_s28, 4  ;;  %vm35_vm0 = vcmp.eq.s32.totalorder %v34_v1, 0  ;;  %s48_s29 = int_to_ptr.vmem [resolvable:$true] %s47_s29 }
  0x11   :  { %s74_s30 = scalar_lea.vmem %s48_s29, 16  ;;  %s78_s2 = scalar_lea.vmem %s48_s29, 32 }
  0x12   :  { %p75_p3 = scmp.ne.s32.totalorder %s48_s29, %s74_s30  ;;  %p79_p4 = scmp.lt.s32.totalorder %s48_s29, %s48_s29 }
  0x13   :  { %p80_p5 = scmp.lt.s32.totalorder %s78_s2, %s74_s30 }
  0x14   :  { %s27_s23 = smul.f32 %s60_s20, %s57_s17 }
  0x15   :  { %s29_s24 = smul.f32 %s60_s20, %s58_s18  ;;  %p81_p6 = por %p80_p5, %p79_p4 }
  0x16   :  { %s28_s25 = sadd.f32 %s27_s23, %s20_s16  ;;  %s31_s26 = smul.f32 %s61_s22, %s59_s19 }
  0x17   :  { %s30_s27 = sadd.f32 %s56_s21, %s29_s24  ;;  %p82_p7 = pnand %p81_p6, %p75_p3 }
  0x18   :  { %v36_v2 = vstv %s28_s25 }
  0x19   :  { %s32_s0 = sadd.f32 %s31_s26, %s30_s27 }
  0x1b   :  { %v37_v3 = vstv %s32_s0 }
  0x1c   :  { %v38_v4 = vsel %vm35_vm0, %v36_v2, %v37_v3 }
  0x1d   :  { %40 = vst.msk [vmem:[#allocation5] sm:$0x1] %vm39_vm1, %v38_v4 }
  0x1e   :  { %85 = shalt.err (!%p82_p7)
}
  0x1f   :  { %s86_s5 = scalar_lea.hbm %s137_s1, 16 }
  0x20   :  { %p87_p8 = scmp.ne.s32.totalorder %s137_s1, %s86_s5  ;;  %p90_p9 = scmp.lt.u32.totalorder %s86_s5, %s137_s1 }
  0x22   :  { %p92_p10 = pnand %p90_p9, %p87_p8 }
  0x24   :  { %95 = shalt.err (!%p92_p10)
}
  0x25   :  { %50 = dma.vmem_to_hbm [thread:$0]  %s48_s29, 16, %s137_s1, [#allocation3]  }
  0x26   :  { %98 = dma.done.wait [#allocation3], 16  }
  0x27   :  { %99 = vsyncadd [#allocation3], 4294967280 }
  0x28   :  { %54 = vsyncpa [#allocation3], 1 }
  0x29   :  { %55 = vsyncpa [#allocation4], 1 }

</bundles_post_ra>
